<compile_context>
chip_gen: v7x
topology: tpu7x:2x2x1
jax: 0.10.0
libtpu: 0.0.40
codegen_flags: <defaults>
</compile_context>

<pallas_src>
import math
import functools

import jax
import jax.numpy as jnp
from jax.experimental import pallas as pl
from jax.experimental.pallas import tpu as pltpu

LANE = 128          # feature dims zero-padded to multiples of this (lane-dense)
SUBLANE_BF16 = 16   # bf16 vreg = [16, 128] -> batch tiles rounded to multiples of 16


def _round_up(x, m):
    return ((x + m - 1) // m) * m


def build_layer_dims(n_start, n_layer, n_hidden, scale_factor=1.2, n_end=None):
    """Replicates NLayerNet.get_model(): list of (in_dim, out_dim, activation_after)."""
    if n_end is None:
        n_end = n_start
    up_layer = n_layer // 2
    same_layer = 1 if (n_layer % 2) else 0
    layers = [(n_start, n_hidden, False)]          # layer_1: no activation after it
    temp_hidden = n_hidden
    for _ in range(up_layer):
        new_hidden = int(math.ceil(temp_hidden * scale_factor))
        layers.append((temp_hidden, new_hidden, True))
        temp_hidden = new_hidden
    for _ in range(same_layer):
        layers.append((temp_hidden, temp_hidden, True))
    for _ in range(up_layer):
        new_hidden = int(math.floor(temp_hidden * (1.0 / scale_factor)))
        layers.append((temp_hidden, new_hidden, True))
        temp_hidden = new_hidden
    layers.append((temp_hidden, n_end, False))     # final Linear, no activation
    return layers


def init_params(key, layer_dims):
    """nn.Linear-style init: U(-1/sqrt(fan_in), 1/sqrt(fan_in)); W stored as (in, out)."""
    params = []
    for (fan_in, fan_out, _) in layer_dims:
        key, kw, kb = jax.random.split(key, 3)
        bound = 1.0 / math.sqrt(fan_in)
        w = jax.random.uniform(kw, (fan_in, fan_out), jnp.float32, -bound, bound)
        b = jax.random.uniform(kb, (fan_out,), jnp.float32, -bound, bound)
        params.append((w, b))
    return params


def prepare_params(params, act_flags):
    """One-time host-side parameter prep (hoisted out of the per-call forward).

    * Folds layer 0 into layer 1 (no activation between them in the module):
        relu((x W0 + b0) W1 + b1) == relu(x (W0 W1) + (b0 W1 + b1))     [done in f32]
    * Zero-pads every feature dim to one shared lane-dense width P (multiple of 128).
    * Casts weights to bf16 (MXU-native) and stacks them into a single (L, P, P) tensor;
      biases stay f32, stacked into (L, 1, P). Padded rows/cols/bias lanes are zero, so
      padded lanes stay exactly 0 through every layer (relu(0) = 0).
    Returns (w_stack, b_stack, act_flags_after_fold).
    """
    params = [(jnp.asarray(w, jnp.float32), jnp.asarray(b, jnp.float32))
              for (w, b) in params]
    flags = list(act_flags)
    if len(params) >= 2 and not flags[0]:
        (w0, b0), (w1, b1) = params[0], params[1]
        params = [(w0 @ w1, b0 @ w1 + b1)] + params[2:]
        flags = flags[1:]                           # folded layer keeps layer 1's flag

    dims = [params[0][0].shape[0]] + [w.shape[1] for (w, _) in params]
    P = _round_up(max(dims), LANE)
    L = len(params)
    w_stack = jnp.zeros((L, P, P), jnp.bfloat16)
    b_stack = jnp.zeros((L, 1, P), jnp.float32)
    for i, (w, b) in enumerate(params):
        fi, fo = w.shape
        w_stack = w_stack.at[i, :fi, :fo].set(w.astype(jnp.bfloat16))
        b_stack = b_stack.at[i, 0, :fo].set(b)
    return w_stack, b_stack, tuple(flags)


def _pick_batch_tile(batch):
    """Tile heuristic from the perf review: amortize the ~0.35 us per-grid-step cost.
    Whole batch in one step up to 512 rows; 512-row tiles above that (>= 2 steps keeps
    the pipeline busy and lets v7x's two TensorCores split the 'parallel' batch axis).
    Always a multiple of 16 (bf16 sublane packing)."""
    b16 = _round_up(batch, SUBLANE_BF16)
    return b16 if b16 <= 512 else 512


def mlp_kernel(act_flags, x_ref, w_ref, b_ref, out_ref):
    """Fused MLP forward for one (TB, P) batch tile.
    x_ref: (TB, P) bf16; w_ref: (L, P, P) bf16; b_ref: (L, 1, P) f32; out_ref bf16."""
    h = x_ref[...]                                            # bf16, straight to MXU
    n = len(act_flags)
    for i, apply_act in enumerate(act_flags):                 # static Python unroll
        acc = jnp.dot(h, w_ref[i], preferred_element_type=jnp.float32) + b_ref[i]
        if apply_act:
            acc = jnp.maximum(acc, 0.0)                       # ReLU in f32 (v5e-safe)
        if i + 1 < n:
            h = acc.astype(jnp.bfloat16)                      # bf16 only at boundaries
        else:
            out_ref[...] = acc.astype(out_ref.dtype)          # bf16 writeback


@functools.partial(jax.jit, static_argnames=("act_flags", "n_out"))
def nlayer_net_forward(x, w_stack, b_stack, *, act_flags, n_out):
    """x: (B, n_in) float32. w_stack/b_stack/act_flags come from prepare_params."""
    B, n_in = x.shape
    L, P, _ = w_stack.shape

    tb = _pick_batch_tile(B)
    B_pad = _round_up(_round_up(B, SUBLANE_BF16), tb)
    x_p = jnp.zeros((B_pad, P), jnp.bfloat16).at[:B, :n_in].set(x.astype(jnp.bfloat16))

    kernel = functools.partial(mlp_kernel, tuple(act_flags))
    out_p = pl.pallas_call(
        kernel,
        grid=(B_pad // tb,),
        in_specs=[
            pl.BlockSpec((tb, P), lambda i: (i, 0)),          # streamed batch tile
            pl.BlockSpec((L, P, P), lambda i: (0, 0, 0)),     # weights: constant index,
            pl.BlockSpec((L, 1, P), lambda i: (0, 0, 0)),     # biases : VMEM-resident
        ],
        out_specs=pl.BlockSpec((tb, P), lambda i: (i, 0)),
        out_shape=jax.ShapeDtypeStruct((B_pad, P), jnp.bfloat16),
        compiler_params=pltpu.CompilerParams(
            dimension_semantics=("parallel",)),               # megacore-shardable axis
    )(x_p, w_stack, b_stack)

    return out_p[:B, :n_out].astype(x.dtype)


def reference_forward_mirror(x, w_stack, b_stack, act_flags, n_in, n_out):
    """Pure-JAX reference mirroring the kernel's numerics exactly (bf16 operands,
    f32 accumulation / bias / relu, bf16 layer boundaries, bf16 output)."""
    B = x.shape[0]
    P = w_stack.shape[1]
    h = jnp.zeros((B, P), jnp.bfloat16).at[:, :n_in].set(x.astype(jnp.bfloat16))
    for i, apply_act in enumerate(act_flags):
        acc = jnp.dot(h, w_stack[i], preferred_element_type=jnp.float32) + b_stack[i]
        if apply_act:
            acc = jnp.maximum(acc, 0.0)
        h = acc.astype(jnp.bfloat16)
    return h[:, :n_out].astype(x.dtype)


def reference_forward_f32(x, params, act_flags):
    """Pure-f32 reference of the original (unfolded) module math."""
    h = x
    for (w, b), apply_act in zip(params, act_flags):
        h = h @ w + b
        if apply_act:
            h = jnp.maximum(h, 0.0)
    return h


if __name__ == "__main__":
    # TODO(synk): htmisc.activation_selector is external; ReLU is assumed for 'activation'.
    n_start, n_layer, n_hidden = 4, 3, 32
    batch = 64   # small example; one 64-row grid step

    layer_dims = build_layer_dims(n_start, n_layer, n_hidden, scale_factor=1.2)
    act_flags = tuple(a for (_, _, a) in layer_dims)
    n_end = layer_dims[-1][1]

    key = jax.random.PRNGKey(0)
    kx, kp = jax.random.split(key)
    x = jax.random.normal(kx, (batch, n_start), dtype=jnp.float32)
    params = init_params(kp, layer_dims)

    # One-time parameter preparation (fold + pad + cast + stack), then jitted forward.
    w_stack, b_stack, folded_flags = prepare_params(params, act_flags)

    out = nlayer_net_forward(x, w_stack, b_stack,
                             act_flags=folded_flags, n_out=n_end)
    out = jax.block_until_ready(out)
    assert out.shape == (batch, n_end), out.shape

    # Exact mirror of the kernel's numerics (bf16 weights/activations, f32 accumulate).
    ref = reference_forward_mirror(x, w_stack, b_stack, folded_flags,
                                   n_in=n_start, n_out=n_end)
    assert jnp.allclose(out, ref, atol=1e-3, rtol=1e-3), (
        "mismatch vs bf16-mirroring reference: max abs err "
        f"{float(jnp.max(jnp.abs(out - ref)))}")

    # Loose semantic check vs the pure-f32 (torch-equivalent) math: bf16 weights and
    # activations make ~1e-2 absolute deviation expected; this is NOT bit parity.
    ref32 = reference_forward_f32(x, params, act_flags)
    assert jnp.allclose(out, ref32, atol=5e-2, rtol=5e-2), (
        "semantic drift vs f32 reference too large: max abs err "
        f"{float(jnp.max(jnp.abs(out - ref32)))}")

    print("KERNEL_OK")
</pallas_src>

<mosaic_0001>
module attributes {stable_mosaic.version = 11 : i64} {
  func.func @mlp_kernel(%arg0: i32, %arg1: memref<64x128xbf16, #tpu.memory_space<vmem>>, %arg2: memref<4x128x128xbf16, #tpu.memory_space<vmem>>, %arg3: memref<4x1x128xf32, #tpu.memory_space<vmem>>, %arg4: memref<64x128xbf16, #tpu.memory_space<vmem>>) attributes {dimension_semantics = [#tpu.dimension_semantics<parallel>], iteration_bounds = array<i64: 1>, scalar_prefetch = 0 : i64, scratch_operands = 0 : i64, tpu.core_type = #tpu.core_type<tc>, window_params = [{transform_indices = @transform_0, window_bounds = array<i64: 64, 128>}, {pipeline_mode = #tpu.pipeline_mode<synchronous>, transform_indices = @transform_1, window_bounds = array<i64: 4, 128, 128>}, {pipeline_mode = #tpu.pipeline_mode<synchronous>, transform_indices = @transform_2, window_bounds = array<i64: 4, 1, 128>}, {transform_indices = @transform_3, window_bounds = array<i64: 64, 128>}]} {
    %c0 = arith.constant 0 : index
    %c0_0 = arith.constant 0 : index
    %0 = vector.load %arg1[%c0, %c0_0] : memref<64x128xbf16, #tpu.memory_space<vmem>>, vector<64x128xbf16>
    %c0_1 = arith.constant 0 : index
    %c0_2 = arith.constant 0 : index
    %c0_3 = arith.constant 0 : index
    %1 = vector.load %arg2[%c0_1, %c0_2, %c0_3] : memref<4x128x128xbf16, #tpu.memory_space<vmem>>, vector<1x128x128xbf16>
    %2 = vector.shape_cast %1 : vector<1x128x128xbf16> to vector<128x128xbf16>
    %cst = arith.constant dense<0.000000e+00> : vector<64x128xf32>
    %3 = tpu.matmul %0, %2, %cst {dimension_numbers = #tpu.dot_dimension_numbers<[1], [0], [0], [1], [0, 0, 1, 1], [], []>} : vector<64x128xbf16>, vector<128x128xbf16>, vector<64x128xf32> -> vector<64x128xf32>
    %c0_4 = arith.constant 0 : index
    %c0_5 = arith.constant 0 : index
    %c0_6 = arith.constant 0 : index
    %4 = vector.load %arg3[%c0_4, %c0_5, %c0_6] : memref<4x1x128xf32, #tpu.memory_space<vmem>>, vector<1x1x128xf32>
    %5 = vector.shape_cast %4 : vector<1x1x128xf32> to vector<1x128xf32>
    %6 = vector.broadcast %5 : vector<1x128xf32> to vector<64x128xf32>
    %7 = arith.addf %3, %6 : vector<64x128xf32>
    %cst_7 = arith.constant 0.000000e+00 : f32
    %8 = vector.broadcast %cst_7 : f32 to vector<64x128xf32>
    %9 = arith.maximumf %7, %8 : vector<64x128xf32>
    %10 = arith.truncf %9 : vector<64x128xf32> to vector<64x128xbf16>
    %c1 = arith.constant 1 : index
    %c0_8 = arith.constant 0 : index
    %c0_9 = arith.constant 0 : index
    %11 = vector.load %arg2[%c1, %c0_8, %c0_9] : memref<4x128x128xbf16, #tpu.memory_space<vmem>>, vector<1x128x128xbf16>
    %12 = vector.shape_cast %11 : vector<1x128x128xbf16> to vector<128x128xbf16>
    %cst_10 = arith.constant dense<0.000000e+00> : vector<64x128xf32>
    %13 = tpu.matmul %10, %12, %cst_10 {dimension_numbers = #tpu.dot_dimension_numbers<[1], [0], [0], [1], [0, 0, 1, 1], [], []>} : vector<64x128xbf16>, vector<128x128xbf16>, vector<64x128xf32> -> vector<64x128xf32>
    %c1_11 = arith.constant 1 : index
    %c0_12 = arith.constant 0 : index
    %c0_13 = arith.constant 0 : index
    %14 = vector.load %arg3[%c1_11, %c0_12, %c0_13] : memref<4x1x128xf32, #tpu.memory_space<vmem>>, vector<1x1x128xf32>
    %15 = vector.shape_cast %14 : vector<1x1x128xf32> to vector<1x128xf32>
    %16 = vector.broadcast %15 : vector<1x128xf32> to vector<64x128xf32>
    %17 = arith.addf %13, %16 : vector<64x128xf32>
    %cst_14 = arith.constant 0.000000e+00 : f32
    %18 = vector.broadcast %cst_14 : f32 to vector<64x128xf32>
    %19 = arith.maximumf %17, %18 : vector<64x128xf32>
    %20 = arith.truncf %19 : vector<64x128xf32> to vector<64x128xbf16>
    %c2 = arith.constant 2 : index
    %c0_15 = arith.constant 0 : index
    %c0_16 = arith.constant 0 : index
    %21 = vector.load %arg2[%c2, %c0_15, %c0_16] : memref<4x128x128xbf16, #tpu.memory_space<vmem>>, vector<1x128x128xbf16>
    %22 = vector.shape_cast %21 : vector<1x128x128xbf16> to vector<128x128xbf16>
    %cst_17 = arith.constant dense<0.000000e+00> : vector<64x128xf32>
    %23 = tpu.matmul %20, %22, %cst_17 {dimension_numbers = #tpu.dot_dimension_numbers<[1], [0], [0], [1], [0, 0, 1, 1], [], []>} : vector<64x128xbf16>, vector<128x128xbf16>, vector<64x128xf32> -> vector<64x128xf32>
    %c2_18 = arith.constant 2 : index
    %c0_19 = arith.constant 0 : index
    %c0_20 = arith.constant 0 : index
    %24 = vector.load %arg3[%c2_18, %c0_19, %c0_20] : memref<4x1x128xf32, #tpu.memory_space<vmem>>, vector<1x1x128xf32>
    %25 = vector.shape_cast %24 : vector<1x1x128xf32> to vector<1x128xf32>
    %26 = vector.broadcast %25 : vector<1x128xf32> to vector<64x128xf32>
    %27 = arith.addf %23, %26 : vector<64x128xf32>
    %cst_21 = arith.constant 0.000000e+00 : f32
    %28 = vector.broadcast %cst_21 : f32 to vector<64x128xf32>
    %29 = arith.maximumf %27, %28 : vector<64x128xf32>
    %30 = arith.truncf %29 : vector<64x128xf32> to vector<64x128xbf16>
    %c3 = arith.constant 3 : index
    %c0_22 = arith.constant 0 : index
    %c0_23 = arith.constant 0 : index
    %31 = vector.load %arg2[%c3, %c0_22, %c0_23] : memref<4x128x128xbf16, #tpu.memory_space<vmem>>, vector<1x128x128xbf16>
    %32 = vector.shape_cast %31 : vector<1x128x128xbf16> to vector<128x128xbf16>
    %cst_24 = arith.constant dense<0.000000e+00> : vector<64x128xf32>
    %33 = tpu.matmul %30, %32, %cst_24 {dimension_numbers = #tpu.dot_dimension_numbers<[1], [0], [0], [1], [0, 0, 1, 1], [], []>} : vector<64x128xbf16>, vector<128x128xbf16>, vector<64x128xf32> -> vector<64x128xf32>
    %c3_25 = arith.constant 3 : index
    %c0_26 = arith.constant 0 : index
    %c0_27 = arith.constant 0 : index
    %34 = vector.load %arg3[%c3_25, %c0_26, %c0_27] : memref<4x1x128xf32, #tpu.memory_space<vmem>>, vector<1x1x128xf32>
    %35 = vector.shape_cast %34 : vector<1x1x128xf32> to vector<1x128xf32>
    %36 = vector.broadcast %35 : vector<1x128xf32> to vector<64x128xf32>
    %37 = arith.addf %33, %36 : vector<64x128xf32>
    %38 = arith.truncf %37 : vector<64x128xf32> to vector<64x128xbf16>
    %c0_28 = arith.constant 0 : index
    %c0_29 = arith.constant 0 : index
    %39 = vector.load %arg4[%c0_28, %c0_29] : memref<64x128xbf16, #tpu.memory_space<vmem>>, vector<64x128xbf16>
    tpu.vector_store %arg4[%c0_28, %c0_29], %38 {strides = array<i32>} : memref<64x128xbf16, #tpu.memory_space<vmem>>, vector<64x128xbf16>,
    return
  }
  func.func @transform_0(%arg0: i32) -> (i32, i32) {
    %c0_i32 = arith.constant 0 : i32
    %c0_i32_0 = arith.constant 0 : i32
    return %arg0, %c0_i32 : i32, i32
  }
  func.func @transform_1(%arg0: i32) -> (i32, i32, i32) {
    %c0_i32 = arith.constant 0 : i32
    %c0_i32_0 = arith.constant 0 : i32
    %c0_i32_1 = arith.constant 0 : i32
    %c0_i32_2 = arith.constant 0 : i32
    return %c0_i32, %c0_i32_0, %c0_i32_1 : i32, i32, i32
  }
  func.func @transform_2(%arg0: i32) -> (i32, i32, i32) {
    %c0_i32 = arith.constant 0 : i32
    %c0_i32_0 = arith.constant 0 : i32
    %c0_i32_1 = arith.constant 0 : i32
    %c0_i32_2 = arith.constant 0 : i32
    return %c0_i32, %c0_i32_0, %c0_i32_1 : i32, i32, i32
  }
  func.func @transform_3(%arg0: i32) -> (i32, i32) {
    %c0_i32 = arith.constant 0 : i32
    %c0_i32_0 = arith.constant 0 : i32
    return %arg0, %c0_i32 : i32, i32
  }
}

</mosaic_0001>

<bundles_post_ra>
// kernel: nlayer_net_forward.1
= control target key start
LH: loop header
LB: loop body
LE: loop exit
PB: predicated region body
PF: predicated region fallthrough
CT: control target
= control target key end

     0   :  { %8 = vsyncpa [#allocation3], 0  ;;  %s981_s12 = smov [#allocation2]   ;;  %s1052_s0 = inlined_call_operand.vmem [shape: bf16[64,128], index: 0, kind: input, shape index: {}]   ;;  %s1053_s1 = inlined_call_operand.hbm [shape: bf16[4,128,128], index: 1, kind: input, shape index: {}]   ;;  %s1054_s2 = inlined_call_operand.vmem [shape: f32[4,1,128], index: 2, kind: input, shape index: {}]   ;;  %s1055_s3 = inlined_call_operand.vmem [shape: bf16[64,128], index: 3, kind: output, shape index: {}]  }
   0x1   :  { %s16_s13 = sshll.u32 %s981_s12, 4  ;;  %s957_s16 = scalar_lea.hbm %s1053_s1, 4096  ;;  %s17_s13 = int_to_ptr.vmem [resolvable:$true] %s16_s13 }
   0x2   :  { %p958_p0 = scmp.ne.s32.totalorder %s1053_s1, %s957_s16  ;;  %p961_p1 = scmp.lt.u32.totalorder %s957_s16, %s1053_s1 }
   0x4   :  { %p963_p2 = pnand %p961_p1, %p958_p0 }
   0x6   :  { %966 = shalt.err (!%p963_p2)
}
   0x7   :  { %s967_s21 = scalar_lea.vmem %s17_s13, 4096  ;;  %p972_p4 = scmp.lt.s32.totalorder %s17_s13, %s17_s13 }
   0x8   :  { %p968_p3 = scmp.ne.s32.totalorder %s17_s13, %s967_s21  ;;  %p973_p5 = scmp.lt.s32.totalorder %s967_s21, %s967_s21 }
   0xa   :  { %p974_p6 = por %p973_p5, %p972_p4 }
   0xc   :  { %p975_p7 = pnand %p974_p6, %p968_p3 }
   0xe   :  { %978 = shalt.err (!%p975_p7)
}
   0xf   :  { %s982_s22 = smov 64   ;;  %s983_s23 = smov 4  }
  0x10   :  { %22 = dma.hbm_to_vmem [thread:$0]  %s1053_s1, 4096, %s17_s13, [#allocation3], %s982_s22, %s982_s22, %s983_s23  }
  0x11   :  { %979 = dma.done.wait [#allocation3], 4096  }
  0x12   :  { %980 = vsyncadd [#allocation3], 4294963200  ;;  %v921_v0 = vld [vmem:[#allocation2] sm:$0xff]   ;;  %v922_v1 = vld [vmem:[#allocation2 + $0x8] sm:$0xff]  }
  0x13   :  { %822 = vmatprep.subr.bf16.mxu0 %v921_v0  ;;  %v923_v2 = vld [vmem:[#allocation2 + $0x10] sm:$0xff]   ;;  %v924_v3 = vld [vmem:[#allocation2 + $0x18] sm:$0xff]   ;;  %v929_v4 = vld [vmem:[%s1052_s0] sm:$0xff]  }
  0x14   :  { %823 = vmatpush3.bf16.msra.mxu0 %v921_v0  ;;  %838 = vmatprep.mubr.bf16.mxu0 %v929_v4  ;;  %v925_v5 = vld [vmem:[#allocation2 + $0x20] sm:$0xff]   ;;  %v934_v7 = vld [vmem:[#allocation2 + $0x48] sm:$0xff]   ;;  %v935_v9 = vld [vmem:[#allocation2 + $0x50] sm:$0xff]  }
  0x15   :  { %824 = vmatprep.subr.bf16.mxu0 %v922_v1  ;;  %v933_v6 = vld [vmem:[#allocation2 + $0x40] sm:$0xff]   ;;  %v926_v8 = vld [vmem:[#allocation2 + $0x28] sm:$0xff]   ;;  %v927_v10 = vld [vmem:[#allocation2 + $0x30] sm:$0xff]  }
  0x16   :  { %846 = vmatprep.subr.bf16.mxu1 %v933_v6  ;;  %v936_v11 = vld [vmem:[#allocation2 + $0x58] sm:$0xff]   ;;  %v937_v13 = vld [vmem:[#allocation2 + $0x60] sm:$0xff]   ;;  %v938_v14 = vld [vmem:[#allocation2 + $0x68] sm:$0xff]  }
  0x17   :  { %847 = vmatpush3.bf16.msra.mxu1 %v933_v6  ;;  %v928_v12 = vld [vmem:[#allocation2 + $0x38] sm:$0xff]   ;;  %v930_v15 = vld [vmem:[%s1052_s0 + $0x8] sm:$0xff]   ;;  %v931_v16 = vld [vmem:[%s1052_s0 + $0x10] sm:$0xff]  }
  0x18   :  { %825 = vmatpush3.bf16.msra.mxu0 %v922_v1  ;;  %848 = vmatprep.subr.bf16.mxu1 %v934_v7  ;;  %v932_v17 = vld [vmem:[%s1052_s0 + $0x18] sm:$0xff]   ;;  %v939_v18 = vld [vmem:[#allocation2 + $0x70] sm:$0xff]   ;;  %v941_v20 = vld [vmem:[#allocation2 + $0x80] sm:$0xff]  }
  0x19   :  { %826 = vmatprep.subr.bf16.mxu0 %v923_v2  ;;  %v940_v19 = vld [vmem:[#allocation2 + $0x78] sm:$0xff]   ;;  %v942_v21 = vld [vmem:[#allocation2 + $0x88] sm:$0xff]   ;;  %v943_v22 = vld [vmem:[#allocation2 + $0x90] sm:$0xff]  }
  0x1a   :  { %v944_v23 = vld [vmem:[#allocation2 + $0x98] sm:$0xff]   ;;  %v945_v24 = vld [vmem:[#allocation2 + $0xa0] sm:$0xff]   ;;  %v946_v25 = vld [vmem:[#allocation2 + $0xa8] sm:$0xff]  }
  0x1b   :  { %849 = vmatpush3.bf16.msra.mxu1 %v934_v7  ;;  %v692_v26 = vld [vmem:[%s1054_s2] ss:$0 sm:$0xff]  ;;  %v947_v55 = vld [vmem:[#allocation2 + $0xb0] sm:$0xff]   ;;  %v948_v56 = vld [vmem:[#allocation2 + $0xb8] sm:$0xff]  }
  0x1c   :  { %827 = vmatpush3.bf16.msra.mxu0 %v923_v2  ;;  %850 = vmatprep.subr.bf16.mxu1 %v935_v9  ;;  %v949_v57 = vld [vmem:[#allocation2 + $0xc0] sm:$0xff]   ;;  %v950_v58 = vld [vmem:[#allocation2 + $0xc8] sm:$0xff]   ;;  %v951_v59 = vld [vmem:[#allocation2 + $0xd0] sm:$0xff]  }
  0x1d   :  { %828 = vmatprep.subr.bf16.mxu0 %v924_v3  ;;  %v952_v60 = vld [vmem:[#allocation2 + $0xd8] sm:$0xff]   ;;  %v953_v61 = vld [vmem:[#allocation2 + $0xe0] sm:$0xff]   ;;  %v954_v62 = vld [vmem:[#allocation2 + $0xe8] sm:$0xff]  }
  0x1e   :  { %v706_v63 = vld [vmem:[%s1054_s2 + $0x1] ss:$0 sm:$0xff] }
  0x1f   :  { %851 = vmatpush3.bf16.msra.mxu1 %v935_v9 }
  0x20   :  { %829 = vmatpush3.bf16.msra.mxu0 %v924_v3  ;;  %852 = vmatprep.subr.bf16.mxu1 %v936_v11 }
  0x21   :  { %830 = vmatprep.subr.bf16.mxu0 %v925_v5 }
  0x23   :  { %853 = vmatpush3.bf16.msra.mxu1 %v936_v11 }
  0x24   :  { %831 = vmatpush3.bf16.msra.mxu0 %v925_v5  ;;  %854 = vmatprep.subr.bf16.mxu1 %v937_v13 }
  0x25   :  { %832 = vmatprep.subr.bf16.mxu0 %v926_v8 }
  0x27   :  { %855 = vmatpush3.bf16.msra.mxu1 %v937_v13 }
  0x28   :  { %833 = vmatpush3.bf16.msra.mxu0 %v926_v8  ;;  %856 = vmatprep.subr.bf16.mxu1 %v938_v14 }
  0x29   :  { %834 = vmatprep.subr.bf16.mxu0 %v927_v10 }
  0x2b   :  { %857 = vmatpush3.bf16.msra.mxu1 %v938_v14 }
  0x2c   :  { %835 = vmatpush3.bf16.msra.mxu0 %v927_v10  ;;  %858 = vmatprep.subr.bf16.mxu1 %v939_v18 }
  0x2d   :  { %836 = vmatprep.subr.bf16.mxu0 %v928_v12 }
  0x2f   :  { %859 = vmatpush3.bf16.msra.mxu1 %v939_v18 }
  0x30   :  { %837 = vmatpush3.bf16.msra.mxu0 %v928_v12  ;;  %860 = vmatprep.subr.bf16.mxu1 %v940_v19 }
  0x31   :  { %870 = vmatprep.subr.bf16.mxu0 %v941_v20 }
  0x33   :  { %839 = vmatmul.mubr.bf16.vlgmr.msra.gmra.mrb[0].mxu0 %v930_v15  ;;  %861 = vmatpush3.bf16.msra.mxu1 %v940_v19 }
  0x34   :  { %842 = vmatprep.mubr.bf16.mxu0 %v931_v16  ;;  %871 = vmatpush3.bf16.msra.mxu0 %v941_v20 }
  0x35   :  { %872 = vmatprep.subr.bf16.mxu0 %v942_v21  ;;  %894 = vmatprep.subr.bf16.mxu1 %v949_v57 }
  0x38   :  { %873 = vmatpush3.bf16.msra.mxu0 %v942_v21 }
  0x39   :  { %874 = vmatprep.subr.bf16.mxu0 %v943_v22 }
  0x3b   :  { %843 = vmatmul.mubr.bf16.gmra.mrb[4].mxu0 %v932_v17 }
  0x3c   :  { %875 = vmatpush3.bf16.msra.mxu0 %v943_v22 }
  0x3d   :  { %876 = vmatprep.subr.bf16.mxu0 %v944_v23 }
  0x40   :  { %877 = vmatpush3.bf16.msra.mxu0 %v944_v23 }
  0x41   :  { %878 = vmatprep.subr.bf16.mxu0 %v945_v24 }
  0x44   :  { %879 = vmatpush3.bf16.msra.mxu0 %v945_v24 }
  0x45   :  { %880 = vmatprep.subr.bf16.mxu0 %v946_v25 }
  0x48   :  { %881 = vmatpush3.bf16.msra.mxu0 %v946_v25 }
  0x49   :  { %882 = vmatprep.subr.bf16.mxu0 %v947_v55 }
  0x4c   :  { %883 = vmatpush3.bf16.msra.mxu0 %v947_v55 }
  0x4d   :  { %884 = vmatprep.subr.bf16.mxu0 %v948_v56 }
  0x50   :  { %885 = vmatpush3.bf16.msra.mxu0 %v948_v56 }
 0x106   :  { %v840_v27 = vpop.f32.mrb[0].mxu0 }
 0x107   :  { %v175_v28 = vadd.f32 %v840_v27, %v692_v26  ;;  %v166_v29 = vpop.f32.mrb[1].mxu0 }
 0x108   :  { %v167_v30 = vadd.f32 %v692_v26, %v166_v29  ;;  %v841_v31 = vpop.f32.mrb[2].mxu0  ;;  %v956_v29 = vld [vmem:[#allocation2 + $0xf8] sm:$0xff]  }
 0x109   :  { %v178_v32 = vadd.f32 %v841_v31, %v692_v26  ;;  %v169_v33 = vpop.f32.mrb[3].mxu0  ;;  %v199_v35 = vmax.f32 %v175_v28, 0.0  ;;  %v955_v28 = vld [vmem:[#allocation2 + $0xf0] sm:$0xff]  }
 0x10a   :  { %v170_v34 = vadd.f32 %v692_v26, %v169_v33  ;;  %v197_v37 = vmax.f32 %v167_v30, 0.0  ;;  %v716_v30 = vld [vmem:[%s1054_s2 + $0x2] ss:$0 sm:$0xff] }
 0x10b   :  { %v200_v36 = vmax.f32 %v178_v32, 0.0 }
 0x10c   :  { %v198_v38 = vmax.f32 %v170_v34, 0.0 }
 0x10d   :  { %v206_v39 = vpack.c.bf16 %v200_v36, %v199_v35 }
 0x10e   :  { %v844_v40 = vpop.f32.mrb[4].mxu0  ;;  %v205_v41 = vpack.c.bf16 %v198_v38, %v197_v37 }
 0x10f   :  { %v191_v42 = vadd.f32 %v844_v40, %v692_v26  ;;  %v182_v43 = vpop.f32.mrb[5].mxu0 }
 0x110   :  { %v183_v44 = vadd.f32 %v692_v26, %v182_v43  ;;  %v845_v45 = vpop.f32.mrb[6].mxu0  ;;  %862 = vmatprep.mubr.bf16.mxu1 %v205_v41 }
 0x111   :  { %v194_v46 = vadd.f32 %v845_v45, %v692_v26  ;;  %v185_v47 = vpop.f32.mrb[7].mxu0  ;;  %863 = vmatmul.mubr.bf16.vlgmr.msra.gmra.mrb[0].mxu1 %v206_v39  ;;  %v203_v49 = vmax.f32 %v191_v42, 0.0 }
 0x112   :  { %v186_v48 = vadd.f32 %v692_v26, %v185_v47  ;;  %v201_v51 = vmax.f32 %v183_v44, 0.0  ;;  %895 = vmatpush3.bf16.msra.mxu1 %v949_v57 }
 0x113   :  { %v204_v50 = vmax.f32 %v194_v46, 0.0  ;;  %896 = vmatprep.subr.bf16.mxu1 %v950_v58 }
 0x114   :  { %v202_v52 = vmax.f32 %v186_v48, 0.0 }
 0x115   :  { %v208_v53 = vpack.c.bf16 %v204_v50, %v203_v49 }
 0x116   :  { %v207_v54 = vpack.c.bf16 %v202_v52, %v201_v51  ;;  %897 = vmatpush3.bf16.msra.mxu1 %v950_v58 }
 0x117   :  { %898 = vmatprep.subr.bf16.mxu1 %v951_v59 }
 0x118   :  { %866 = vmatprep.mubr.bf16.mxu1 %v207_v54 }
 0x119   :  { %867 = vmatmul.mubr.bf16.gmra.mrb[4].mxu1 %v208_v53 }
 0x11a   :  { %899 = vmatpush3.bf16.msra.mxu1 %v951_v59 }
 0x11b   :  { %900 = vmatprep.subr.bf16.mxu1 %v952_v60 }
 0x11e   :  { %901 = vmatpush3.bf16.msra.mxu1 %v952_v60  ;;  %v726_v60 = vld [vmem:[%s1054_s2 + $0x3] ss:$0 sm:$0xff] }
 0x11f   :  { %902 = vmatprep.subr.bf16.mxu1 %v953_v61 }
 0x122   :  { %903 = vmatpush3.bf16.msra.mxu1 %v953_v61 }
 0x123   :  { %904 = vmatprep.subr.bf16.mxu1 %v954_v62 }
 0x126   :  { %905 = vmatpush3.bf16.msra.mxu1 %v954_v62 }
 0x127   :  { %906 = vmatprep.subr.bf16.mxu1 %v955_v28 }
 0x12a   :  { %907 = vmatpush3.bf16.msra.mxu1 %v955_v28 }
 0x12b   :  { %908 = vmatprep.subr.bf16.mxu1 %v956_v29 }
 0x12e   :  { %909 = vmatpush3.bf16.msra.mxu1 %v956_v29 }
 0x1e4   :  { %v864_v0 = vpop.f32.mrb[0].mxu1 }
 0x1e5   :  { %v325_v1 = vadd.f32 %v864_v0, %v706_v63  ;;  %v316_v2 = vpop.f32.mrb[1].mxu1 }
 0x1e6   :  { %v317_v3 = vadd.f32 %v706_v63, %v316_v2  ;;  %v865_v4 = vpop.f32.mrb[2].mxu1 }
 0x1e7   :  { %v328_v5 = vadd.f32 %v865_v4, %v706_v63  ;;  %v319_v6 = vpop.f32.mrb[3].mxu1  ;;  %v349_v8 = vmax.f32 %v325_v1, 0.0 }
 0x1e8   :  { %v320_v7 = vadd.f32 %v706_v63, %v319_v6  ;;  %v347_v10 = vmax.f32 %v317_v3, 0.0 }
 0x1e9   :  { %v350_v9 = vmax.f32 %v328_v5, 0.0 }
 0x1ea   :  { %v348_v11 = vmax.f32 %v320_v7, 0.0 }
 0x1eb   :  { %v356_v12 = vpack.c.bf16 %v350_v9, %v349_v8 }
 0x1ec   :  { %v355_v13 = vpack.c.bf16 %v348_v11, %v347_v10  ;;  %v868_v14 = vpop.f32.mrb[4].mxu1 }
 0x1ed   :  { %v341_v15 = vadd.f32 %v868_v14, %v706_v63  ;;  %v332_v16 = vpop.f32.mrb[5].mxu1 }
 0x1ee   :  { %v333_v17 = vadd.f32 %v706_v63, %v332_v16  ;;  %v869_v18 = vpop.f32.mrb[6].mxu1  ;;  %886 = vmatprep.mubr.bf16.mxu0 %v355_v13 }
 0x1ef   :  { %v344_v19 = vadd.f32 %v869_v18, %v706_v63  ;;  %v335_v20 = vpop.f32.mrb[7].mxu1  ;;  %887 = vmatmul.mubr.bf16.vlgmr.msra.gmra.mrb[8].mxu0 %v356_v12  ;;  %v353_v22 = vmax.f32 %v341_v15, 0.0 }
 0x1f0   :  { %v336_v21 = vadd.f32 %v706_v63, %v335_v20  ;;  %v351_v24 = vmax.f32 %v333_v17, 0.0 }
 0x1f1   :  { %v354_v23 = vmax.f32 %v344_v19, 0.0 }
 0x1f2   :  { %v352_v25 = vmax.f32 %v336_v21, 0.0 }
 0x1f3   :  { %v358_v26 = vpack.c.bf16 %v354_v23, %v353_v22 }
 0x1f4   :  { %v357_v27 = vpack.c.bf16 %v352_v25, %v351_v24 }
 0x1f6   :  { %890 = vmatprep.mubr.bf16.mxu0 %v357_v27 }
 0x1f7   :  { %891 = vmatmul.mubr.bf16.gmra.mrb[12].mxu0 %v358_v26 }
 0x2c2   :  { %v888_v31 = vpop.f32.mrb[8].mxu0 }
 0x2c3   :  { %v475_v32 = vadd.f32 %v888_v31, %v716_v30  ;;  %v466_v33 = vpop.f32.mrb[9].mxu0 }
 0x2c4   :  { %v467_v34 = vadd.f32 %v716_v30, %v466_v33  ;;  %v889_v35 = vpop.f32.mrb[10].mxu0 }
 0x2c5   :  { %v478_v36 = vadd.f32 %v889_v35, %v716_v30  ;;  %v469_v37 = vpop.f32.mrb[11].mxu0  ;;  %v499_v39 = vmax.f32 %v475_v32, 0.0 }
 0x2c6   :  { %v470_v38 = vadd.f32 %v716_v30, %v469_v37  ;;  %v497_v41 = vmax.f32 %v467_v34, 0.0 }
 0x2c7   :  { %v500_v40 = vmax.f32 %v478_v36, 0.0 }
 0x2c8   :  { %v498_v42 = vmax.f32 %v470_v38, 0.0 }
 0x2c9   :  { %v506_v43 = vpack.c.bf16 %v500_v40, %v499_v39 }
 0x2ca   :  { %v505_v44 = vpack.c.bf16 %v498_v42, %v497_v41  ;;  %v892_v45 = vpop.f32.mrb[12].mxu0 }
 0x2cb   :  { %v491_v46 = vadd.f32 %v892_v45, %v716_v30  ;;  %v482_v47 = vpop.f32.mrb[13].mxu0 }
 0x2cc   :  { %v483_v48 = vadd.f32 %v716_v30, %v482_v47  ;;  %v893_v49 = vpop.f32.mrb[14].mxu0  ;;  %910 = vmatprep.mubr.bf16.mxu1 %v505_v44 }
 0x2cd   :  { %v494_v50 = vadd.f32 %v893_v49, %v716_v30  ;;  %v485_v51 = vpop.f32.mrb[15].mxu0  ;;  %911 = vmatmul.mubr.bf16.vlgmr.msra.gmra.mrb[8].mxu1 %v506_v43  ;;  %v503_v53 = vmax.f32 %v491_v46, 0.0 }
 0x2ce   :  { %v486_v52 = vadd.f32 %v716_v30, %v485_v51  ;;  %v501_v55 = vmax.f32 %v483_v48, 0.0 }
 0x2cf   :  { %v504_v54 = vmax.f32 %v494_v50, 0.0 }
 0x2d0   :  { %v502_v56 = vmax.f32 %v486_v52, 0.0 }
 0x2d1   :  { %v508_v57 = vpack.c.bf16 %v504_v54, %v503_v53 }
 0x2d2   :  { %v507_v58 = vpack.c.bf16 %v502_v56, %v501_v55 }
 0x2d4   :  { %914 = vmatprep.mubr.bf16.mxu1 %v507_v58 }
 0x2d5   :  { %915 = vmatmul.mubr.bf16.gmra.mrb[12].mxu1 %v508_v57 }
 0x3a0   :  { %v912_v59 = vpop.f32.mrb[8].mxu1 }
 0x3a1   :  { %v616_v61 = vpop.f32.mrb[9].mxu1  ;;  %v625_v63 = vadd.f32 %v912_v59, %v726_v60 }
 0x3a2   :  { %v913_v62 = vpop.f32.mrb[10].mxu1  ;;  %v617_v2 = vadd.f32 %v726_v60, %v616_v61 }
 0x3a3   :  { %v628_v0 = vadd.f32 %v913_v62, %v726_v60  ;;  %v619_v1 = vpop.f32.mrb[11].mxu1 }
 0x3a4   :  { %v620_v3 = vadd.f32 %v726_v60, %v619_v1 }
 0x3a5   :  { %v759_v4 = vpack.c.bf16 %v628_v0, %v625_v63 }
 0x3a6   :  { %v754_v5 = vpack.c.bf16 %v620_v3, %v617_v2 }
 0x3a7   :  { %771 = vst [vmem:[%s1055_s3 + $0x8] sm:$0xff] %v759_v4  }
 0x3a8   :  { %755 = vst [vmem:[%s1055_s3] sm:$0xff] %v754_v5   ;;  %v916_v6 = vpop.f32.mrb[12].mxu1 }
 0x3a9   :  { %v632_v7 = vpop.f32.mrb[13].mxu1  ;;  %v641_v9 = vadd.f32 %v916_v6, %v726_v60 }
 0x3aa   :  { %v917_v8 = vpop.f32.mrb[14].mxu1  ;;  %v633_v12 = vadd.f32 %v726_v60, %v632_v7 }
 0x3ab   :  { %v644_v10 = vadd.f32 %v917_v8, %v726_v60  ;;  %v635_v11 = vpop.f32.mrb[15].mxu1 }
 0x3ac   :  { %v636_v13 = vadd.f32 %v726_v60, %v635_v11 }
 0x3ad   :  { %v769_v14 = vpack.c.bf16 %v644_v10, %v641_v9 }
 0x3ae   :  { %v764_v15 = vpack.c.bf16 %v636_v13, %v633_v12 }
 0x3af   :  { %773 = vst [vmem:[%s1055_s3 + $0x18] sm:$0xff] %v769_v14  }
 0x3b0   :  { %772 = vst [vmem:[%s1055_s3 + $0x10] sm:$0xff] %v764_v15  }
 0x3b1   :  { %691 = vsyncpa [#allocation3], 1 }

</bundles_post_ra>
